<compile_context>
chip_gen: v7x
topology: tpu7x:2x2x1
jax: 0.10.0
libtpu: 0.0.40
codegen_flags: <defaults>
</compile_context>

<pallas_src>
import functools
import numbers

import numpy as np
import jax
import jax.numpy as jnp
from jax.experimental import pallas as pl
from jax.experimental.pallas import tpu as pltpu


def _cdiv(a: int, b: int) -> int:
    return -(-a // b)


@functools.lru_cache(maxsize=None)
def _area_weight_matrix(out_size: int, in_size: int) -> np.ndarray:
    """Row-stochastic matrix implementing torch.nn.functional.interpolate
    (mode='area') / adaptive average pooling along one axis:
    window for output i is [floor(i*I/O), ceil((i+1)*I/O))."""
    W = np.zeros((out_size, in_size), dtype=np.float32)
    for i in range(out_size):
        s = (i * in_size) // out_size
        e = -((-(i + 1) * in_size) // out_size)  # ceil((i+1)*I/O)
        W[i, s:e] = 1.0 / float(e - s)
    return W


def _resize_crop_kernel(wwt_ref, wht_ref, x_ref, o_ref):
    # wwt_ref: (W, Wc)      col-averaging matrix, cropped + pre-transposed (resident)
    # wht_ref: (H, Hc)      row-averaging matrix, cropped + pre-transposed (resident)
    # x_ref  : (TB, H, W)   TB native-dtype (n, c) image slices
    # o_ref  : (TB, Hc, Wc)
    tb, h, w = x_ref.shape
    wc = wwt_ref.shape[1]
    hc = wht_ref.shape[1]

    # Cast in VMEM (input streamed from HBM in its native dtype).
    x = x_ref[...].astype(jnp.float32)                               # (TB, H, W)

    # ---- width contraction: ONE big MXU matmul on the flattened block ----
    t = jnp.dot(x.reshape(tb * h, w), wwt_ref[...],
                preferred_element_type=jnp.float32)                  # (TB*H, Wc)
    t = t.reshape(tb, h, wc)                                         # (TB, H, Wc)

    # ---- height contraction: also ONE big un-batched MXU matmul ----------
    # Minor-dim swap (XLU, separate issue slot from the MXU) so (TB, Wc)
    # flattens into the matmul M dimension and H is the contraction.
    tt = jnp.swapaxes(t, 1, 2).reshape(tb * wc, h)                   # (TB*Wc, H)
    u = jnp.dot(tt, wht_ref[...],
                preferred_element_type=jnp.float32)                  # (TB*Wc, Hc)
    o = jnp.swapaxes(u.reshape(tb, wc, hc), 1, 2)                    # (TB, Hc, Wc)

    o_ref[...] = o.astype(o_ref.dtype)


def _vmem_capacity_bytes() -> int:
    try:
        return int(pltpu.get_tpu_info().vmem_capacity_bytes)
    except Exception:
        return 64 * 1024 * 1024   # conservative fallback: v7x per-TensorCore VMEM


def _choose_batch_tile(b: int, per_image_bytes: int, budget_bytes: int) -> int:
    """Largest batch tile fitting the VMEM budget, with the grid split into
    >= 2 (preferably an even number of) steps so both TensorCores on v7x get
    balanced work.  Non-divisor tiles are fine: the grid uses cdiv and the
    last block is partial."""
    tb = max(1, min(b, budget_bytes // max(per_image_bytes, 1)))
    steps = _cdiv(b, tb)
    if b > 1 and steps == 1:
        steps = 2
    if 1 < steps < b and steps % 2 == 1:
        alt_tb = _cdiv(b, steps + 1)
        if _cdiv(b, alt_tb) % 2 == 0:
            steps = _cdiv(b, alt_tb)
    return _cdiv(b, steps)


@functools.partial(jax.jit, static_argnums=(1, 2))
def _resize_center_crop_nchw(x: jnp.ndarray, cropx: int, cropy: int) -> jnp.ndarray:
    n, c, h, w = x.shape

    # --- image_resize_shortest_edge(input, max(size)) semantics -----------
    target = max(cropx, cropy)
    scale = target / min(h, w)
    # int() truncation matches the PyTorch source; max() guards the fp edge
    # case where the shortest edge truncates to target-1 (which would make
    # the center-crop start negative / the slice under-sized).
    h_new = max(int(h * scale), cropy)
    w_new = max(int(w * scale), cropx)
    wh = _area_weight_matrix(h_new, h)       # (h_new, h)
    ww = _area_weight_matrix(w_new, w)       # (w_new, w)

    # --- center_crop(resized, size=(cropx, cropy)) semantics --------------
    starty = max(0, min(h_new // 2 - cropy // 2, h_new - cropy))
    startx = max(0, min(w_new // 2 - cropx // 2, w_new - cropx))
    wht_c = jnp.asarray(np.ascontiguousarray(wh[starty:starty + cropy].T))  # (H, Hc)
    wwt_c = jnp.asarray(np.ascontiguousarray(ww[startx:startx + cropx].T))  # (W, Wc)

    b = n * c
    xb = x.reshape(b, h, w)                  # native dtype, NO wrapper-side cast

    # --- batch-tile selection against a generation-aware VMEM budget ------
    itemsize = x.dtype.itemsize
    f32 = 4
    per_image = (
        2 * h * w * itemsize                 # double-buffered native input block
        + 2 * cropy * cropx * itemsize       # double-buffered native output block
        + h * w * f32                        # in-kernel f32 cast of x
        + 2 * h * cropx * f32                # t and its transpose
        + 2 * cropy * cropx * f32            # u / transposed f32 output
    )
    fixed = 2 * f32 * (h * cropy + w * cropx)    # double-buffered resident weights
    vmem_cap = _vmem_capacity_bytes()
    vmem_limit = max(32 * 1024 * 1024,
                     min(int(vmem_cap * 0.75), 100 * 1024 * 1024))
    budget = max(int(vmem_limit * 0.8) - fixed, per_image)

    tb = _choose_batch_tile(b, per_image, budget)
    grid = (_cdiv(b, tb),)

    out = pl.pallas_call(
        _resize_crop_kernel,
        out_shape=jax.ShapeDtypeStruct((b, cropy, cropx), x.dtype),
        grid_spec=pltpu.PrefetchScalarGridSpec(
            num_scalar_prefetch=0,
            grid=grid,
            in_specs=[
                pl.BlockSpec((w, cropx), lambda i: (0, 0)),     # Ww^T (resident)
                pl.BlockSpec((h, cropy), lambda i: (0, 0)),     # Wh^T (resident)
                pl.BlockSpec((tb, h, w), lambda i: (i, 0, 0)),  # image slices
            ],
            out_specs=pl.BlockSpec((tb, cropy, cropx), lambda i: (i, 0, 0)),
        ),
        compiler_params=pltpu.CompilerParams(
            dimension_semantics=("parallel",),
            vmem_limit_bytes=vmem_limit),
    )(wwt_c, wht_c, xb)

    return out.reshape(n, c, cropy, cropx)


class ResizeCenterCropper:
    """JAX/Pallas port of the PyTorch ResizeCenterCropper (channels_last=False,
    4-D NCHW input). size is (w, h) or an int (square)."""

    def __init__(self, size, channels_last: bool = False):
        if isinstance(size, numbers.Number):
            size = (int(size), int(size))
        assert size is None or len(size) == 2, "forced input size must be len of 2 (w, h)"
        assert not channels_last, "kernel implements NCHW layout only"
        self._size = None if size is None else (int(size[0]), int(size[1]))
        self.channels_last = channels_last

    def __call__(self, x: jnp.ndarray) -> jnp.ndarray:
        if self._size is None:
            return x
        assert x.ndim == 4, "expected NCHW input"
        cropx, cropy = self._size
        return _resize_center_crop_nchw(x, cropx, cropy)


def _reference(x: jnp.ndarray, size) -> jnp.ndarray:
    """Pure-JAX reference of resize-shortest-edge(area) + center crop."""
    n, c, h, w = x.shape
    target = max(size)
    scale = target / min(h, w)
    h_new, w_new = int(h * scale), int(w * scale)
    wh = jnp.asarray(_area_weight_matrix(h_new, h))
    ww = jnp.asarray(_area_weight_matrix(w_new, w))
    resized = jnp.einsum("oh,nchw,pw->ncop", wh, x.astype(jnp.float32), ww)
    cropx, cropy = size
    startx = w_new // 2 - cropx // 2
    starty = h_new // 2 - cropy // 2
    return resized[:, :, starty:starty + cropy, startx:startx + cropx]


if __name__ == "__main__":
    key = jax.random.PRNGKey(0)
    # NCHW input: batch=2, channels=4, H=16, W=20 (non-square to exercise
    # both the shortest-edge resize and the width-wise center crop).
    x = jax.random.uniform(key, (2, 4, 16, 20), dtype=jnp.float32) * 255.0

    cropper = ResizeCenterCropper(size=(8, 8), channels_last=False)
    out = jax.block_until_ready(cropper(x))

    ref = jax.block_until_ready(_reference(x, (8, 8)))
    assert out.shape == (2, 4, 8, 8), out.shape
    np.testing.assert_allclose(np.asarray(out), np.asarray(ref),
                               rtol=1e-5, atol=1e-4)
    print("KERNEL_OK")
</pallas_src>

<mosaic_0001>
module attributes {stable_mosaic.version = 11 : i64} {
  func.func @_resize_crop_kernel(%arg0: i32, %arg1: memref<20x8xf32, #tpu.memory_space<vmem>>, %arg2: memref<16x8xf32, #tpu.memory_space<vmem>>, %arg3: memref<4x16x20xf32, #tpu.memory_space<vmem>>, %arg4: memref<4x8x8xf32, #tpu.memory_space<vmem>>) attributes {dimension_semantics = [#tpu.dimension_semantics<parallel>], iteration_bounds = array<i64: 2>, scalar_prefetch = 0 : i64, scratch_operands = 0 : i64, tpu.core_type = #tpu.core_type<tc>, window_params = [{pipeline_mode = #tpu.pipeline_mode<synchronous>, transform_indices = @transform_0, window_bounds = array<i64: 20, 8>}, {pipeline_mode = #tpu.pipeline_mode<synchronous>, transform_indices = @transform_1, window_bounds = array<i64: 16, 8>}, {transform_indices = @transform_2, window_bounds = array<i64: 4, 16, 20>}, {transform_indices = @transform_3, window_bounds = array<i64: 4, 8, 8>}]} {
    %c0 = arith.constant 0 : index
    %c0_0 = arith.constant 0 : index
    %c0_1 = arith.constant 0 : index
    %0 = vector.load %arg3[%c0, %c0_0, %c0_1] : memref<4x16x20xf32, #tpu.memory_space<vmem>>, vector<4x16x20xf32>
    %1 = vector.shape_cast %0 : vector<4x16x20xf32> to vector<64x20xf32>
    %c0_2 = arith.constant 0 : index
    %c0_3 = arith.constant 0 : index
    %2 = vector.load %arg1[%c0_2, %c0_3] : memref<20x8xf32, #tpu.memory_space<vmem>>, vector<20x8xf32>
    %cst = arith.constant dense<0.000000e+00> : vector<64x8xf32>
    %3 = tpu.matmul %1, %2, %cst {dimension_numbers = #tpu.dot_dimension_numbers<[1], [0], [0], [1], [0, 0, 1, 1], [], []>} : vector<64x20xf32>, vector<20x8xf32>, vector<64x8xf32> -> vector<64x8xf32>
    %4 = vector.shape_cast %3 : vector<64x8xf32> to vector<4x16x8xf32>
    %5 = tpu.transpose %4, [0, 2, 1] : vector<4x16x8xf32> -> vector<4x8x16xf32>
    %6 = vector.shape_cast %5 : vector<4x8x16xf32> to vector<32x16xf32>
    %c0_4 = arith.constant 0 : index
    %c0_5 = arith.constant 0 : index
    %7 = vector.load %arg2[%c0_4, %c0_5] : memref<16x8xf32, #tpu.memory_space<vmem>>, vector<16x8xf32>
    %cst_6 = arith.constant dense<0.000000e+00> : vector<32x8xf32>
    %8 = tpu.matmul %6, %7, %cst_6 {dimension_numbers = #tpu.dot_dimension_numbers<[1], [0], [0], [1], [0, 0, 1, 1], [], []>} : vector<32x16xf32>, vector<16x8xf32>, vector<32x8xf32> -> vector<32x8xf32>
    %9 = vector.shape_cast %8 : vector<32x8xf32> to vector<4x8x8xf32>
    %10 = tpu.transpose %9, [0, 2, 1] : vector<4x8x8xf32> -> vector<4x8x8xf32>
    %c0_7 = arith.constant 0 : index
    %c0_8 = arith.constant 0 : index
    %c0_9 = arith.constant 0 : index
    %11 = vector.load %arg4[%c0_7, %c0_8, %c0_9] : memref<4x8x8xf32, #tpu.memory_space<vmem>>, vector<4x8x8xf32>
    tpu.vector_store %arg4[%c0_7, %c0_8, %c0_9], %10 {strides = array<i32>} : memref<4x8x8xf32, #tpu.memory_space<vmem>>, vector<4x8x8xf32>,
    return
  }
  func.func @transform_0(%arg0: i32) -> (i32, i32) {
    %c0_i32 = arith.constant 0 : i32
    %c0_i32_0 = arith.constant 0 : i32
    %c0_i32_1 = arith.constant 0 : i32
    return %c0_i32, %c0_i32_0 : i32, i32
  }
  func.func @transform_1(%arg0: i32) -> (i32, i32) {
    %c0_i32 = arith.constant 0 : i32
    %c0_i32_0 = arith.constant 0 : i32
    %c0_i32_1 = arith.constant 0 : i32
    return %c0_i32, %c0_i32_0 : i32, i32
  }
  func.func @transform_2(%arg0: i32) -> (i32, i32, i32) {
    %c0_i32 = arith.constant 0 : i32
    %c0_i32_0 = arith.constant 0 : i32
    %c0_i32_1 = arith.constant 0 : i32
    return %arg0, %c0_i32, %c0_i32_0 : i32, i32, i32
  }
  func.func @transform_3(%arg0: i32) -> (i32, i32, i32) {
    %c0_i32 = arith.constant 0 : i32
    %c0_i32_0 = arith.constant 0 : i32
    %c0_i32_1 = arith.constant 0 : i32
    return %arg0, %c0_i32, %c0_i32_0 : i32, i32, i32
  }
}

</mosaic_0001>

<bundles_post_ra>
// kernel: _resize_center_crop_nchw.1
= control target key start
LH: loop header
LB: loop body
LE: loop exit
PB: predicated region body
PF: predicated region fallthrough
CT: control target
= control target key end

     0   :  { %8 = vsyncpa [#allocation3], 0  ;;  %s1444_s0 = inlined_call_operand.hbm [shape: f32[20,8], index: 0, kind: input, shape index: {}]   ;;  %s1445_s1 = inlined_call_operand.hbm [shape: f32[16,8], index: 1, kind: input, shape index: {}]   ;;  %s1446_s2 = inlined_call_operand.hbm [shape: f32[8,16,20], index: 2, kind: input, shape index: {}]   ;;  %s1447_s3 = inlined_call_operand.hbm [shape: f32[8,8,8], index: 3, kind: output, shape index: {}]  }
   0x1   :  { %9 = vsyncpa [#allocation6], 0 }
   0x2   :  { %10 = vsyncpa [#allocation4], 0 }
   0x3   :  { %12 = vsyncpa [#allocation4 + $0x1], 0  ;;  %s1185_s12 = smov 0   ;;  %s1187_s13 = smov 0  }
   0x4   :  { %s1189_s14 = smov 0   ;;  %s1191_s15 = smov 0  }
   0x5 LB: > { %s1206_s16 = sadd.s32 4294967295, %s1155_s15   ;;  %s831_s17 = sadd.s32 4294967294, %s1155_s15   ;;  %s1155_s15 = sphi %s1191_s15, %s1475_s15   ;;  %s1151_s14 = sphi %s1189_s14, %s1474_s14   ;;  %s1147_s13 = sphi %s1187_s13, %s1473_s13   ;;  %s1143_s12 = sphi %s1185_s12, %s1472_s12  }
   0x6   : > { %s1210_s18 = sadd.s32 1, %s1155_s15   ;;  %s67_s19 = sadd.s32 1, %s1151_s14 }
   0x7   : > { %s64_s20 = ssub.s32 %s1155_s15, %s1210_s18  ;;  %p74_p0 = scmp.ne.s32.totalorder %s1151_s14, %s1147_s13 }
   0x8   : > { %p65_p1 = scmp.eq.s32.totalorder %s64_s20, 0  ;;  %p75_p2 = scmp.eq.s32.totalorder %s1155_s15, 0 }
   0x9   : > { %p80_p3 = scmp.ne.s32.totalorder %s1147_s13, %s1143_s12  ;;  %p1448_p4 = scmp.eq.s32.totalorder %s1206_s16, 0 }
   0xa   : > { %s1222_s21 = scalar_select %p65_p1, %s1151_s14, %s67_s19  }
   0xb   : > { %p1224_p5 = por %p75_p2, %p74_p0  ;;  %p1230_p6 = por %p1448_p4, %p80_p3 }
   0xc   : > { %p104_p7 = scmp.eq.s32.totalorder %s1206_s16, 1  ;;  %p110_p8 = scmp.eq.s32.totalorder %s831_s17, 1 }
   0xd   : > { %s1453_s22 = scalar_select %p1224_p5, 1, 0 }
   0xe   : > { %s1454_s23 = scalar_select %p1230_p6, 1, 0 }
   0xf   : > { %p832_p9 = scmp.ge.s32.totalorder %s1155_s15, 1  ;;  %p117_p10 = scmp.lt.s32.totalorder %s1155_s15, 3 }
  0x10   : > { %p1237_p11 = por %p104_p7, %p74_p0  ;;  %p1241_p12 = por %p110_p8, %p80_p3 }
  0x11   : > { %p1245_p13 = pnand %p832_p9, %p117_p10  ;;  %s1157_s27 = smov [#allocation2]  }
  0x12   : > { %s1455_s24 = scalar_select %p1237_p11, 1, 0 }
  0x13   : > { %s1456_s25 = scalar_select %p1241_p12, 1, 0 }
  0x14   : > { %s1457_s26 = scalar_select %p1245_p13, 1, 0 }
  0x15   : > { %p935_p1 = pneg %p1245_p13  ;;  %s129_s28 = sshll.u32 %s1157_s27, 4  ;;  %s130_s28 = int_to_ptr.vmem [resolvable:$true] %s129_s28 }
  0x16   : > { %s1158_s30 = smov [#allocation5]   ;;  %s995_s7 = scalar_lea.hbm %s1444_s0, 384 }
  0x17   : > { %p1253_p2 = pnand %p935_p1, %p1448_p4  ;;  %s142_s4 = sshll.u32 %s1158_s30, 4  ;;  %s143_s4 = int_to_ptr.vmem [resolvable:$true] %s142_s4 }
  0x18   : > { %p996_p7 = scmp.ne.s32.totalorder %s1444_s0, %s995_s7  ;;  %p1002_p1 = scmp.lt.u32.totalorder %s995_s7, %s1444_s0 }
  0x19   : > { %p997_p8 = pneg %p1253_p2 }
  0x1b   : > { %p998_p9 = pnand %p997_p8, %p996_p7 }
  0x1d   : > { %p999_p10 = pneg %p998_p9 }
  0x1f   : > { %p1004_p0 = pnand %p1002_p1, %p999_p10 }
  0x21   : > { %1007 = shalt.err (!%p1004_p0)
}
  0x22   : > { %s1008_s17 = scalar_lea.vmem %s130_s28, 384  ;;  %p1016_p11 = scmp.lt.s32.totalorder %s130_s28, %s130_s28 }
  0x23   : > { %p1009_p4 = scmp.ne.s32.totalorder %s130_s28, %s1008_s17  ;;  %p1017_p6 = scmp.lt.s32.totalorder %s1008_s17, %s1008_s17 }
  0x25   : > { %p1011_p3 = pnand %p1009_p4, %p997_p8  ;;  %p1018_p13 = por %p1017_p6, %p1016_p11 }
  0x27   : > { %p1012_p12 = pneg %p1011_p3 }
  0x29   : > { %p1019_p5 = pnand %p1018_p13, %p1012_p12 }
  0x2b   : > { %1022 = shalt.err (!%p1019_p5)
}
  0x2c   : > { %s1159_s19 = smov 128   ;;  %s1160_s20 = smov 8  }
  0x2d   : > { %938 = dma.hbm_to_vmem [thread:$0]  (!%p1253_p2), %s1444_s0, 384, %s130_s28, [#allocation3], %s1159_s19, %s1159_s19, %s1160_s20  }
  0x2e   : > { %p1459_p4 = scmp.ne.s32.totalorder %s1453_s22, 0  ;;  %p1460_p0 = scmp.lt.s32.totalorder %s1155_s15, 2 }
  0x2f   : > { %s1023_s8 = scalar_lea.hbm %s1445_s1, 256 }
  0x30   : > { %p1288_p3 = pnand %p1460_p0, %p1459_p4  ;;  %p1024_p5 = scmp.ne.s32.totalorder %s1445_s1, %s1023_s8 }
  0x31   : > { %p1030_p12 = scmp.lt.u32.totalorder %s1023_s8, %s1445_s1 }
  0x32   : > { %s1461_s5 = scalar_select %p1288_p3, 1, 0 }
  0x33   : > { %p1026_p6 = pnand %p1024_p5, %p997_p8 }
  0x35   : > { %p1027_p11 = pneg %p1026_p6 }
  0x37   : > { %p1032_p13 = pnand %p1030_p12, %p1027_p11 }
  0x39   : > { %1035 = shalt.err (!%p1032_p13)
}
  0x3a   : > { %s1036_s11 = scalar_lea.vmem %s143_s4, 256  ;;  %p1044_p1 = scmp.lt.s32.totalorder %s143_s4, %s143_s4 }
  0x3b   : > { %p1037_p7 = scmp.ne.s32.totalorder %s143_s4, %s1036_s11  ;;  %p1045_p4 = scmp.lt.s32.totalorder %s1036_s11, %s1036_s11 }
  0x3d   : > { %p1039_p9 = pnand %p1037_p7, %p997_p8  ;;  %p1046_p0 = por %p1045_p4, %p1044_p1 }
  0x3f   : > { %p1040_p10 = pneg %p1039_p9 }
  0x41   : > { %p1047_p3 = pnand %p1046_p0, %p1040_p10 }
  0x43   : > { %1050 = shalt.err (!%p1047_p3)
}
  0x44   : > { %941 = dma.hbm_to_vmem [thread:$0]  (!%p1253_p2), %s1445_s1, 256, %s143_s4, [#allocation6], %s1159_s19, %s1159_s19, %s1160_s20  }
  0x45   : > { %s156_s30 = sand.u32 1, %s1155_s15   ;;  %s158_s6 = sand.u32 1, %s1151_s14  }
  0x46   : > { %s836_s7 = sshll.u32 %s158_s6, 6  ;;  %s864_s8 = sshll.u32 %s1155_s15, 10 }
  0x47   : > { %s1321_s29 = scalar_lea.hbm %s1446_s2, %s864_s8  ;;  %s160_s28 = scalar_lea.vmem [#allocation7], %s836_s7 }
  0x48   : > { %s168_s22 = sshll.u32 %s160_s28, 4  ;;  %s1325_s11 = scalar_lea.sflag [#allocation3], %s156_s30  ;;  %s1323_s22 = int_to_ptr.vmem [resolvable:$true] %s168_s22 }
  0x49   : > { %s1051_s4 = scalar_lea.hbm %s1321_s29, 1024  ;;  %p1462_p8 = scmp.ne.s32.totalorder %s1461_s5, 0 }
  0x4a   : > { %p1052_p2 = scmp.ne.s32.totalorder %s1321_s29, %s1051_s4  ;;  %s1056_s6 = scalar_lea.hbm %s1446_s2, 2048 }
  0x4b   : > { %p1053_p3 = pneg %p1462_p8  ;;  %p1057_p11 = scmp.lt.u32.totalorder %s1321_s29, %s1446_s2 }
  0x4c   : > { %p1058_p12 = scmp.lt.u32.totalorder %s1056_s6, %s1051_s4  ;;  %p1060_p7 = scmp.lt.u32.totalorder %s1051_s4, %s1321_s29 }
  0x4d   : > { %p1054_p5 = pnand %p1053_p3, %p1052_p2 }
  0x4e   : > { %p1059_p13 = por %p1058_p12, %p1057_p11 }
  0x4f   : > { %p1055_p6 = pneg %p1054_p5 }
  0x50   : > { %p1061_p9 = por %p1060_p7, %p1059_p13 }
  0x52   : > { %p1062_p10 = pnand %p1061_p9, %p1055_p6 }
  0x54   : > { %1065 = shalt.err (!%p1062_p10)
}
  0x55   : > { %s1066_s30 = scalar_lea.vmem %s1323_s22, 1024  ;;  %s1161_s7 = smov [#allocation7]  }
  0x56   : > { %p1067_p1 = scmp.ne.s32.totalorder %s1323_s22, %s1066_s30  ;;  %s1071_s10 = sshll.u32 %s1161_s7, 4  ;;  %s1072_s10 = int_to_ptr.vmem [resolvable:$false] %s1071_s10 }
  0x57   : > { %s1073_s28 = scalar_lea.vmem %s1072_s10, 2048  ;;  %p1074_p2 = scmp.lt.s32.totalorder %s1323_s22, %s1072_s10 }
  0x58   : > { %p1069_p4 = pnand %p1067_p1, %p1053_p3  ;;  %p1075_p5 = scmp.lt.s32.totalorder %s1073_s28, %s1066_s30 }
  0x5a   : > { %p1070_p0 = pneg %p1069_p4  ;;  %p1076_p11 = por %p1075_p5, %p1074_p2 }
  0x5c   : > { %p1077_p12 = pnand %p1076_p11, %p1070_p0 }
  0x5e   : > { %1080 = shalt.err (!%p1077_p12)
}
  0x5f   : > { %945 = dma.hbm_to_vmem [thread:$0]  (!%p1462_p8), %s1321_s29, 1024, %s1323_s22, %s1325_s11, %s1159_s19, %s1159_s19, %s1160_s20  }
  0x60   : > { %p1463_p3 = scmp.ne.s32.totalorder %s1457_s26, 0 }
  0x61   : > { %p1464_p6 = scmp.eq.s32.totalorder (!%p1463_p3), %s1206_s16, 0 }
  0x62   : > { %180 = sbr.rel (%p1463_p3) target bundleno = 834 (0x342), region = 32 }
  0x69   : > { %1126 = dma.done.wait (%p1464_p6), [#allocation3], 384   ;;  %p1465_p13 = pmov %p1464_p6 }
  0x6a   : > { %p1466_p7 = pmov %p1464_p6 }
  0x6b   : > { %1128 = vsyncadd (%p1465_p13), [#allocation3], 4294966912 }
  0x6c   : > { %1130 = dma.done.wait (%p1466_p7), [#allocation6], 256   ;;  %p1467_p9 = pmov %p1464_p6 }
  0x6d   : > { %s190_s5 = sand.u32 1, %s1206_s16   ;;  %s1368_s19 = sand.u32 1, %s1147_s13  }
  0x6e   : > { %1132 = vsyncadd (%p1467_p9), [#allocation6], 4294967040  ;;  %s843_s26 = sshll.u32 %s1368_s19, 6  ;;  %s191_s20 = scalar_lea.sflag [#allocation3], %s190_s5 }
  0x6f   : > { %s1371_s29 = scalar_lea.vmem [#allocation7], %s843_s26  ;;  %p1468_p8 = scmp.ne.s32.totalorder %s1454_s23, 0 }
  0x71   : > { %1134 = dma.done.wait (%p1468_p8), %s191_s20, 1024  }
  0x72   : > { %1136 = vsyncadd (%p1468_p8), %s191_s20, 4294966272  ;;  %vm230_vm0 = vcmask 162816   ;;  %v227_v0 = vld [vmem:[#allocation2] sm:$0xff]  ;;  %v228_v1 = vld [vmem:[#allocation2 + $0x8] sm:$0xff]  ;;  %vm255_vm1 = vcmask 1043456   ;;  %vm494_vm2 = vcmask 130048  }
  0x73   : > { %v911_v2 = vpack.c.bf16 %v228_v1, %v227_v0  ;;  %v219_v3 = vld [vmem:[%s1371_s29] sm:$0xff]  ;;  %v229_v4 = vld [vmem:[#allocation2 + $0x10] sm:$0xf]  ;;  %v225_v5 = vld [vmem:[%s1371_s29 + $0x30] sm:$0xff]  ;;  %s844_s23 = sshll.u32 %s1368_s19, 5  ;;  %vm720_vm3 = vcmask 64512  }
  0x74   : > { %889 = vmatprep.mubr.msk.f32.mxu0 %vm230_vm0, %v219_v3  ;;  %v220_v6 = vld [vmem:[%s1371_s29 + $0x8] sm:$0xff]  ;;  %898 = vmatprep.mubr.msk.f32.mxu1 %vm230_vm0, %v225_v5  ;;  %v226_v7 = vld [vmem:[%s1371_s29 + $0x38] sm:$0xff]  ;;  %v221_v8 = vld [vmem:[%s1371_s29 + $0x10] sm:$0xff]  ;;  %s216_s22 = scalar_lea.vmem [#allocation8], %s844_s23  ;;  %s865_s4 = sshll.u32 %s1206_s16, 9 }
  0x75   : > { %912 = vmatprep.subr.bf16.mxu0 %v911_v2  ;;  %919 = vmatprep.subr.bf16.mxu1 %v911_v2  ;;  %v222_v9 = vld [vmem:[%s1371_s29 + $0x18] sm:$0xff]  ;;  %v223_v10 = vld [vmem:[%s1371_s29 + $0x20] sm:$0xff]  ;;  %v224_v11 = vld [vmem:[%s1371_s29 + $0x28] sm:$0xff]  ;;  %s739_s11 = sshll.u32 %s216_s22, 4  ;;  %s1400_s6 = scalar_lea.hbm %s1447_s3, %s865_s4  ;;  %s1395_s11 = int_to_ptr.vmem [resolvable:$true] %s739_s11 }
  0x76   : > { %914 = vmatpush3.bf16.msra.mxu0 %v911_v2  ;;  %921 = vmatpush3.bf16.msra.mxu1 %v911_v2  ;;  %v492_v12 = vld [vmem:[#allocation5] sm:$0xff]  ;;  %v493_v13 = vld [vmem:[#allocation5 + $0x8] sm:$0xff]  ;;  %s726_s8 = scalar_lea.sflag [#allocation4], %s1368_s19  ;;  %s1081_s9 = scalar_lea.vmem %s1395_s11, 512 }
  0x77   : > { %887 = vmatprep.subr.msk.mxu0 %vm255_vm1, %v229_v4  ;;  %920 = vmatprep.subr.msk.mxu1 %vm255_vm1, %v229_v4  ;;  %v915_v14 = vpack.c.bf16 %v493_v13, %v492_v12  ;;  %p1082_p10 = scmp.ne.s32.totalorder %s1395_s11, %s1081_s9  ;;  %p1469_p1 = scmp.ne.s32.totalorder %s1455_s24, 0 }
  0x78   : > { %s1162_s16 = smov [#allocation8]  }
  0x79   : > { %p1083_p4 = pnand %p1082_p10, %p1469_p1  ;;  %s1085_s30 = sshll.u32 %s1162_s16, 4  ;;  %s1086_s30 = int_to_ptr.vmem [resolvable:$false] %s1085_s30 }
  0x7a   : > { %888 = vmatpush3.msk.msra.mxu0 %vm255_vm1, %v229_v4  ;;  %922 = vmatpush3.msk.msra.mxu1 %vm255_vm1, %v229_v4  ;;  %s1087_s7 = scalar_lea.vmem %s1086_s30, 1024  ;;  %p1088_p2 = scmp.lt.s32.totalorder %s1395_s11, %s1086_s30 }
  0x7b   : > { %890 = vmatmul.mubr.msk.f32.vlgmr.msra.gmra.mrb[0].mxu0 %vm230_vm0, %v220_v6  ;;  %899 = vmatmul.mubr.msk.f32.vlgmr.msra.gmra.mrb[0].mxu1 %vm230_vm0, %v226_v7  ;;  %p1084_p0 = pneg %p1083_p4  ;;  %p1089_p5 = scmp.lt.s32.totalorder %s1087_s7, %s1081_s9 }
  0x7c   : > { %892 = vmatprep.mubr.msk.f32.mxu0 %vm230_vm0, %v221_v8  ;;  %916 = vmatprep.subr.bf16.mxu1 %v915_v14 }
  0x7d   : > { %918 = vmatpush3.bf16.msra.mxu1 %v915_v14  ;;  %p1090_p11 = por %p1089_p5, %p1088_p2 }
  0x7f   : > { %893 = vmatmul.mubr.msk.f32.gmra.mrb[2].mxu0 %vm230_vm0, %v222_v9  ;;  %p1091_p12 = pnand %p1090_p11, %p1084_p0 }
  0x80   : > { %895 = vmatprep.mubr.msk.f32.mxu0 %vm230_vm0, %v223_v10 }
  0x83   : > { %896 = vmatmul.mubr.msk.f32.gmra.mrb[4].mxu0 %vm230_vm0, %v224_v11 }
 0x14e   : > { %v891_v15 = vpop.f32.mrb[0].mxu0  ;;  %v900_v16 = vpop.f32.mrb[0].mxu1 }
 0x14f   : > { %v325_v17 = vpop.f32.mrb[1].mxu0  ;;  %v355_v18 = vpop.f32.mrb[1].mxu1 }
 0x150   : > { %364 = vxpose.xlu0.b32.start [1/2] (short) (narrow) %v325_v17, 8 }
 0x152   : > { %v894_v19 = vpop.f32.mrb[2].mxu0 }
 0x153   : > { %v335_v20 = vpop.f32.mrb[3].mxu0 }
 0x154   : > { %365 = vxpose.xlu0.b32.end [2/2] (short) (narrow) %v891_v15, 8  ;;  %396 = vxpose.xlu1.b32.start [1/2] (short) (narrow) %v335_v20, 8 }
 0x156   : > { %v897_v21 = vpop.f32.mrb[4].mxu0 }
 0x157   : > { %v345_v22 = vpop.f32.mrb[5].mxu0 }
 0x158   : > { %397 = vxpose.xlu1.b32.end [2/2] (short) (narrow) %v894_v19, 8  ;;  %428 = vxpose.xlu0.b32.start [1/2] (short) (narrow) %v345_v22, 8 }
 0x15c   : > { %460 = vxpose.xlu1.b32.start [1/2] (short) (narrow) %v355_v18, 8  ;;  %429 = vxpose.xlu0.b32.end [2/2] (short) (narrow) %v897_v21, 8 }
 0x160   : > { %461 = vxpose.xlu1.b32.end [2/2] (short) (narrow) %v900_v16, 8 }
 0x1d0   : > { %v380_v23 = vpop.trf.xlu0 }
 0x1d1   : > { %905 = vmatprep.mubr.msk.f32.mxu1 %vm494_vm2, %v380_v23 }
 0x1d4   : > { %v412_v24 = vpop.trf.xlu1 }
 0x1d5   : > { %906 = vmatmul.mubr.msk.f32.vlgmr.msra.gmra.mrb[2].mxu1 %vm494_vm2, %v412_v24 }
 0x1d8   : > { %v444_v25 = vpop.trf.xlu0 }
 0x1d9   : > { %908 = vmatprep.mubr.msk.f32.mxu1 %vm494_vm2, %v444_v25 }
 0x1dc   : > { %v476_v26 = vpop.trf.xlu1 }
 0x1dd   : > { %909 = vmatmul.mubr.msk.f32.gmra.mrb[4].mxu1 %vm494_vm2, %v476_v26 }
 0x2a8   : > { %v907_v27 = vpop.f32.mrb[2].mxu1 }
 0x2a9   : > { %v573_v28 = vpop.f32.mrb[3].mxu1  ;;  %624 = vxpose.xlu1.b32.start.end [1/1] (short) (narrow) %v907_v27, 8 }
 0x2aa   : > { %592 = vxpose.xlu0.b32.start.end [1/1] (short) (narrow) %v573_v28, 8 }
 0x2b0   : > { %v910_v29 = vpop.f32.mrb[4].mxu1 }
 0x2b1   : > { %688 = vxpose.xlu1.b32.start.end [1/1] (short) (narrow) %v910_v29, 8  ;;  %v583_v30 = vpop.f32.mrb[5].mxu1 }
 0x2b2   : > { %656 = vxpose.xlu0.b32.start.end [1/1] (short) (narrow) %v583_v30, 8 }
 0x329   : > { %v640_v31 = vpop.trf.xlu1 }
 0x32a   : > { %722 = vst.msk [vmem:[%s216_s22 + $0x8] sm:$0xff] %vm720_vm3, %v640_v31  ;;  %v608_v32 = vpop.trf.xlu0 }
 0x32b   : > { %721 = vst.msk [vmem:[%s216_s22] sm:$0xff] %vm720_vm3, %v608_v32 }
 0x331   : > { %v704_v33 = vpop.trf.xlu1 }
 0x332   : > { %724 = vst.msk [vmem:[%s216_s22 + $0x18] sm:$0xff] %vm720_vm3, %v704_v33  ;;  %v672_v34 = vpop.trf.xlu0 }
 0x333   : > { %723 = vst.msk [vmem:[%s216_s22 + $0x10] sm:$0xff] %vm720_vm3, %v672_v34 }
 0x334   : > { %1094 = shalt.err (!%p1091_p12)
}
 0x335   : > { %s1095_s10 = scalar_lea.hbm %s1400_s6, 512  ;;  %s1099_s26 = scalar_lea.hbm %s1447_s3, 1024 }
 0x336   : > { %p1096_p3 = scmp.ne.s32.totalorder %s1400_s6, %s1095_s10  ;;  %p1100_p7 = scmp.lt.u32.totalorder %s1400_s6, %s1447_s3 }
 0x337   : > { %p1101_p9 = scmp.lt.u32.totalorder %s1099_s26, %s1095_s10  ;;  %p1103_p10 = scmp.lt.u32.totalorder %s1095_s10, %s1400_s6 }
 0x338   : > { %p1097_p6 = pnand %p1096_p3, %p1469_p1 }
 0x339   : > { %p1102_p8 = por %p1101_p9, %p1100_p7 }
 0x33a   : > { %p1098_p13 = pneg %p1097_p6 }
 0x33b   : > { %p1104_p4 = por %p1103_p10, %p1102_p8 }
 0x33d   : > { %p1105_p0 = pnand %p1104_p4, %p1098_p13 }
 0x33f   : > { %1108 = shalt.err (!%p1105_p0)
}
 0x340   : > { %s1163_s23 = smov 128   ;;  %s1164_s22 = smov 8  }
 0x341   : > { %933 = dma.vmem_to_hbm [thread:$0]  (%p1469_p1), %s1395_s11, 512, %s1400_s6, %s726_s8, %s1163_s23, %s1163_s23, %s1164_s22  }
 0x342 PF: > { %s754_s4 = sand.u32 1, %s1143_s12   ;;  %p1470_p2 = scmp.ne.s32.totalorder %s1456_s25, 0 }
 0x343   : > { %p1471_p5 = scmp.ge.s32.totalorder %s1155_s15, 2  ;;  %s755_s17 = scalar_lea.sflag [#allocation4], %s754_s4 }
 0x345   : > { %p947_p11 = pnand %p1471_p5, %p1470_p2 }
 0x347   : > { %1138 = dma.done.wait (!%p947_p11), %s755_s17, 512  }
 0x348   : > { %1140 = vsyncadd (!%p947_p11), %s755_s17, 4294966784  ;;  %p15_p12 = scmp.ge.s32.totalorder %s1210_s18, 4   ;;  %s1472_s12 = smov %s1147_s13 }
 0x349   : > { %s1473_s13 = smov %s1151_s14  ;;  %s1474_s14 = smov %s1222_s21 }
 0x34a   : > { %s1475_s15 = smov %s1210_s18  ;;  %17 = sbr.rel (!%p15_p12) target bundleno = 5 (0x5), region = 84 }
 0x351   :  { %760 = vsyncpa [#allocation3], 1 }
 0x352   :  { %762 = vsyncpa [#allocation3 + $0x1], 1 }
 0x353   :  { %763 = vsyncpa [#allocation6], 1 }
 0x354   :  { %764 = vsyncpa [#allocation4], 1 }
 0x355   :  { %766 = vsyncpa [#allocation4 + $0x1], 1 }

</bundles_post_ra>
